<compile_context>
chip_gen: v5e
topology: v5e:2x2
jax: 0.10.0
libtpu: 0.0.40
codegen_flags: <defaults>
</compile_context>

<pallas_src>
import jax
import jax.numpy as jnp
from jax import lax
from jax.experimental import pallas as pl
from jax.experimental.pallas import tpu as pltpu


def _round_up(x, m):
    return (x + m - 1) // m * m


def _make_kernel(weight_resident: bool, tk: int, num_k_steps: int):
    """Builds the fused (scale*W) @ P^T + bias, ReLU kernel.

    w_ref:    (Cout, K_pad) bf16 if resident, else (Cout, tk) bf16
    p_ref:    (tk, tm)      bf16   im2col patches^T slice (tm on lane axis)
    bias_ref: (Cout, 1)     f32    folded BatchNorm bias
    o_ref:    (Cout, tm)    bf16   output tile (lane-dense)
    acc_ref:  (Cout, tm)    f32    VMEM accumulator, resident across K axis
    """

    def kernel(w_ref, p_ref, bias_ref, o_ref, acc_ref):
        k = pl.program_id(1)

        @pl.when(k == 0)
        def _init():
            # Bias folded into the accumulator init (lane broadcast once/tile).
            acc_ref[...] = jnp.broadcast_to(bias_ref[...], acc_ref.shape)

        if weight_resident and num_k_steps > 1:
            # Weight lives fully in VMEM; slice the tk chunk for this K step.
            w = w_ref[:, pl.ds(pl.multiple_of(k * tk, tk), tk)]
        else:
            w = w_ref[...]

        acc_ref[...] += jnp.dot(w, p_ref[...],
                                preferred_element_type=jnp.float32)

        @pl.when(k == pl.num_programs(1) - 1)
        def _finalize():
            o_ref[...] = jnp.maximum(acc_ref[...], 0.0).astype(o_ref.dtype)

    return kernel


def _im2col_T(x, kernel_size, stride, padding, dilation, *,
              compute_dtype, k_pad, m_pad):
    """NCHW input -> transposed, zero-padded patch matrix (k_pad, m_pad), bf16.

    Cast to compute_dtype happens FIRST so the whole intermediate is built in
    bf16 (no f32 patch-matrix round trip through HBM).
    """
    N, Cin, H, W = x.shape
    KH = KW = kernel_size
    Ho = (H + 2 * padding - dilation * (KH - 1) - 1) // stride + 1
    Wo = (W + 2 * padding - dilation * (KW - 1) - 1) // stride + 1

    x = x.astype(compute_dtype)
    xp = jnp.pad(x, ((0, 0), (0, 0), (padding, padding), (padding, padding)))
    taps = []
    for kh in range(KH):
        for kw in range(KW):
            h0, w0 = kh * dilation, kw * dilation
            taps.append(
                xp[:, :, h0:h0 + (Ho - 1) * stride + 1:stride,
                         w0:w0 + (Wo - 1) * stride + 1:stride])  # (N,Cin,Ho,Wo)
    p = jnp.stack(taps, axis=0)                      # (KH*KW, N, Cin, Ho, Wo)
    pT = jnp.transpose(p, (2, 0, 1, 3, 4))           # (Cin, KH*KW, N, Ho, Wo)
    pT = pT.reshape(Cin * KH * KW, N * Ho * Wo)      # K order matches weight's
    pT = jnp.pad(pT, ((0, k_pad - Cin * KH * KW), (0, m_pad - N * Ho * Wo)))
    return pT, Ho, Wo


def basic_conv(x, weight, gamma, beta, running_mean, running_var,
               *, stride=1, padding=0, dilation=1, eps=1e-5,
               compute_dtype=jnp.bfloat16, out_dtype=jnp.bfloat16):
    # x:      (N, Cin, H, W)      float32
    # weight: (Cout, Cin, KH, KW) float32 (Conv2d, bias=False, groups=1)
    N, Cin, H, W = x.shape
    Cout, Cin_w, KH, KW = weight.shape
    assert KH == KW, "square kernels only in this demo"
    assert Cin_w == Cin, "groups != 1 not supported here"

    Ho = (H + 2 * padding - dilation * (KH - 1) - 1) // stride + 1
    Wo = (W + 2 * padding - dilation * (KW - 1) - 1) // stride + 1
    K = Cin * KH * KW
    M = N * Ho * Wo

    # ---- tile selection -----------------------------------------------------
    # tm: output lane axis, 128-multiple -> unmasked stores. Big tiles amortise
    # per-grid-step overhead; cap so there are >= 2 M-tiles (megacore on v7x).
    tm = min(2048, _round_up(M, 128))
    if _round_up(M, tm) // tm < 2 and M > 128:
        tm = _round_up((M + 1) // 2, 128)
    M_pad = _round_up(M, tm)

    if K <= 1024:
        tk = _round_up(K, 8)       # single K step; block == full K dim
    else:
        tk = 512                   # multiple of 8 (sublane) and 128 (lane)
    K_pad = _round_up(K, tk)

    grid = (M_pad // tm, K_pad // tk)

    # ---- operands -----------------------------------------------------------
    pT, _, _ = _im2col_T(x, KH, stride, padding, dilation,
                         compute_dtype=compute_dtype, k_pad=K_pad, m_pad=M_pad)

    # Fold inference-mode BatchNorm (running stats) into conv weight & bias:
    #   y = scale * (W @ p) + bias  ==  (scale * W) @ p + bias
    scale = gamma / jnp.sqrt(running_var + eps)                 # (Cout,)
    w2d = weight.reshape(Cout, K) * scale[:, None]              # (Cout, K)
    w2d = jnp.pad(w2d, ((0, 0), (0, K_pad - K))).astype(compute_dtype)
    bias = (beta - running_mean * scale).reshape(Cout, 1).astype(jnp.float32)

    # Keep the folded weight fully VMEM-resident (fetched once) when small.
    itemsize = jnp.dtype(compute_dtype).itemsize
    weight_resident = Cout * K_pad * itemsize <= 4 * 1024 * 1024
    if weight_resident:
        w_spec = pl.BlockSpec((Cout, K_pad), lambda i, k: (0, 0))
        w_bytes = Cout * K_pad * itemsize
    else:
        w_spec = pl.BlockSpec((Cout, tk), lambda i, k: (0, k))
        w_bytes = Cout * K_pad * itemsize * grid[0]   # refetched per M-tile

    kernel = _make_kernel(weight_resident, tk, grid[1])

    cost = pl.CostEstimate(
        flops=2 * M_pad * K_pad * Cout,
        transcendentals=0,
        bytes_accessed=(w_bytes
                        + pT.size * pT.dtype.itemsize
                        + bias.size * 4
                        + Cout * M_pad * jnp.dtype(out_dtype).itemsize))

    outT = pl.pallas_call(
        kernel,
        out_shape=jax.ShapeDtypeStruct((Cout, M_pad), out_dtype),
        grid_spec=pltpu.PrefetchScalarGridSpec(
            num_scalar_prefetch=0,
            grid=grid,
            in_specs=[
                w_spec,                                          # folded weight
                pl.BlockSpec((tk, tm), lambda i, k: (k, i)),     # patches^T
                pl.BlockSpec((Cout, 1), lambda i, k: (0, 0)),    # folded bias
            ],
            out_specs=pl.BlockSpec((Cout, tm), lambda i, k: (0, i)),
            scratch_shapes=[pltpu.VMEM((Cout, tm), jnp.float32)],
        ),
        compiler_params=pltpu.CompilerParams(
            dimension_semantics=("parallel", "arbitrary"),
            # >= 32 MiB explicitly (v5e default scoped VMEM is only 16 MiB);
            # worst-case live buffers at tm=2048/tk=512 stay well below this.
            vmem_limit_bytes=32 * 1024 * 1024),
        cost_estimate=cost,
    )(w2d, pT, bias)

    # (Cout, M_pad) -> (Cout, M) -> (N, Cout, Ho, Wo)
    out = outT[:, :M].reshape(Cout, N, Ho, Wo)
    return jnp.transpose(out, (1, 0, 2, 3))


def reference_f32(x, weight, gamma, beta, running_mean, running_var,
                  *, stride, padding, dilation, eps=1e-5):
    y = lax.conv_general_dilated(
        x, weight,
        window_strides=(stride, stride),
        padding=((padding, padding), (padding, padding)),
        rhs_dilation=(dilation, dilation),
        dimension_numbers=("NCHW", "OIHW", "NCHW"))
    s = (gamma / jnp.sqrt(running_var + eps)).reshape(1, -1, 1, 1)
    b = (beta - running_mean * gamma / jnp.sqrt(running_var + eps)).reshape(1, -1, 1, 1)
    return jnp.maximum(y * s + b, 0.0)


def reference_matched_precision(x, weight, gamma, beta, running_mean,
                                running_var, *, stride, padding, dilation,
                                eps=1e-5):
    # Same bf16-quantised folded weights / activations, f32 accumulation:
    # isolates kernel error from deliberate bf16 quantisation error.
    scale = gamma / jnp.sqrt(running_var + eps)
    wq = (weight * scale[:, None, None, None]).astype(jnp.bfloat16)
    xq = x.astype(jnp.bfloat16)
    y = lax.conv_general_dilated(
        xq, wq,
        window_strides=(stride, stride),
        padding=((padding, padding), (padding, padding)),
        rhs_dilation=(dilation, dilation),
        dimension_numbers=("NCHW", "OIHW", "NCHW"),
        preferred_element_type=jnp.float32)
    b = (beta - running_mean * scale).reshape(1, -1, 1, 1)
    return jnp.maximum(y + b, 0.0)


if __name__ == "__main__":
    # BasicConv(in_planes=4, out_planes=8, kernel_size=3, stride=1, padding=1,
    #           relu=True, bn=True, bias=False), inference mode.
    N, Cin, H, W = 2, 4, 16, 16
    Cout, ksize, stride, padding, dilation = 8, 3, 1, 1, 1

    key = jax.random.PRNGKey(0)
    kx, kw = jax.random.split(key)
    x = jax.random.normal(kx, (N, Cin, H, W), dtype=jnp.float32)
    weight = 0.1 * jax.random.normal(kw, (Cout, Cin, ksize, ksize), dtype=jnp.float32)

    # Deterministic inference-mode BatchNorm parameters / running statistics.
    # TODO(synk): training-mode BN (batch statistics + momentum update) not
    # reproduced; BN folded with running stats (PyTorch eval()-mode semantics).
    gamma = 1.0 + 0.1 * jnp.arange(Cout, dtype=jnp.float32)
    beta = 0.05 * jnp.arange(Cout, dtype=jnp.float32)
    running_mean = 0.01 * jnp.arange(Cout, dtype=jnp.float32)
    running_var = 1.0 + 0.02 * jnp.arange(Cout, dtype=jnp.float32)

    out = basic_conv(x, weight, gamma, beta, running_mean, running_var,
                     stride=stride, padding=padding, dilation=dilation)
    out = jax.block_until_ready(out)
    assert out.shape == (N, Cout, H, W)
    out_f32 = out.astype(jnp.float32)

    # 1) Matched-precision check (bf16 folded weights/activations, f32 accum);
    #    tolerance covers accumulation-order noise + the bf16 output rounding.
    ref_q = reference_matched_precision(
        x, weight, gamma, beta, running_mean, running_var,
        stride=stride, padding=padding, dilation=dilation)
    assert jnp.allclose(out_f32, ref_q, rtol=1e-2, atol=1e-2)

    # 2) Full-f32 module-semantics check; bf16 input/output quantisation stays
    #    well below this tolerance at these magnitudes.
    ref = reference_f32(x, weight, gamma, beta, running_mean, running_var,
                        stride=stride, padding=padding, dilation=dilation)
    assert jnp.allclose(out_f32, ref, rtol=2e-2, atol=2e-2)

    print("KERNEL_OK")
</pallas_src>

<mosaic_0001>
module attributes {stable_mosaic.version = 11 : i64} {
  func.func @kernel(%arg0: i32, %arg1: i32, %arg2: memref<8x40xbf16, #tpu.memory_space<vmem>>, %arg3: memref<40x256xbf16, #tpu.memory_space<vmem>>, %arg4: memref<8x1xf32, #tpu.memory_space<vmem>>, %arg5: memref<8x256xbf16, #tpu.memory_space<vmem>>, %arg6: memref<8x256xf32, #tpu.memory_space<vmem>>) attributes {dimension_semantics = [#tpu.dimension_semantics<parallel>, #tpu.dimension_semantics<arbitrary>], iteration_bounds = array<i64: 2, 1>, scalar_prefetch = 0 : i64, scratch_operands = 1 : i64, tpu.core_type = #tpu.core_type<tc>, window_params = [{pipeline_mode = #tpu.pipeline_mode<synchronous>, transform_indices = @transform_0, window_bounds = array<i64: 8, 40>}, {transform_indices = @transform_1, window_bounds = array<i64: 40, 256>}, {pipeline_mode = #tpu.pipeline_mode<synchronous>, transform_indices = @transform_2, window_bounds = array<i64: 8, 1>}, {transform_indices = @transform_3, window_bounds = array<i64: 8, 256>}]} {
    %c0_i32 = arith.constant 0 : i32
    %0 = arith.cmpi eq, %arg1, %c0_i32 : i32
    %1 = arith.extui %0 : i1 to i32
    %c0_i32_0 = arith.constant 0 : i32
    %2 = arith.cmpi ne, %1, %c0_i32_0 : i32
    scf.if %2 {
      %c0_10 = arith.constant 0 : index
      %c0_11 = arith.constant 0 : index
      %12 = vector.load %arg4[%c0_10, %c0_11] : memref<8x1xf32, #tpu.memory_space<vmem>>, vector<8x1xf32>
      %13 = vector.shape_cast %12 : vector<8x1xf32> to vector<8x1xf32>
      %14 = vector.broadcast %13 : vector<8x1xf32> to vector<8x256xf32>
      %c0_12 = arith.constant 0 : index
      %c0_13 = arith.constant 0 : index
      %15 = vector.load %arg6[%c0_12, %c0_13] : memref<8x256xf32, #tpu.memory_space<vmem>>, vector<8x256xf32>
      tpu.vector_store %arg6[%c0_12, %c0_13], %14 {strides = array<i32>} : memref<8x256xf32, #tpu.memory_space<vmem>>, vector<8x256xf32>,
    } else {
    }
    %c0 = arith.constant 0 : index
    %c0_1 = arith.constant 0 : index
    %3 = vector.load %arg2[%c0, %c0_1] : memref<8x40xbf16, #tpu.memory_space<vmem>>, vector<8x40xbf16>
    %c0_2 = arith.constant 0 : index
    %c0_3 = arith.constant 0 : index
    %4 = vector.load %arg6[%c0_2, %c0_3] : memref<8x256xf32, #tpu.memory_space<vmem>>, vector<8x256xf32>
    %c0_4 = arith.constant 0 : index
    %c0_5 = arith.constant 0 : index
    %5 = vector.load %arg3[%c0_4, %c0_5] : memref<40x256xbf16, #tpu.memory_space<vmem>>, vector<40x256xbf16>
    %cst = arith.constant dense<0.000000e+00> : vector<8x256xf32>
    %6 = tpu.matmul %3, %5, %cst {dimension_numbers = #tpu.dot_dimension_numbers<[1], [0], [0], [1], [0, 0, 1, 1], [], []>} : vector<8x40xbf16>, vector<40x256xbf16>, vector<8x256xf32> -> vector<8x256xf32>
    %7 = arith.addf %4, %6 : vector<8x256xf32>
    %c0_6 = arith.constant 0 : index
    %c0_7 = arith.constant 0 : index
    %8 = vector.load %arg6[%c0_6, %c0_7] : memref<8x256xf32, #tpu.memory_space<vmem>>, vector<8x256xf32>
    tpu.vector_store %arg6[%c0_6, %c0_7], %7 {strides = array<i32>} : memref<8x256xf32, #tpu.memory_space<vmem>>, vector<8x256xf32>,
    %c0_i32_8 = arith.constant 0 : i32
    %9 = arith.cmpi eq, %arg1, %c0_i32_8 : i32
    %10 = arith.extui %9 : i1 to i32
    %c0_i32_9 = arith.constant 0 : i32
    %11 = arith.cmpi ne, %10, %c0_i32_9 : i32
    scf.if %11 {
      %c0_10 = arith.constant 0 : index
      %c0_11 = arith.constant 0 : index
      %12 = vector.load %arg6[%c0_10, %c0_11] : memref<8x256xf32, #tpu.memory_space<vmem>>, vector<8x256xf32>
      %cst_12 = arith.constant 0.000000e+00 : f32
      %13 = vector.broadcast %cst_12 : f32 to vector<8x256xf32>
      %14 = arith.maximumf %12, %13 : vector<8x256xf32>
      %15 = arith.truncf %14 : vector<8x256xf32> to vector<8x256xbf16>
      %c0_13 = arith.constant 0 : index
      %c0_14 = arith.constant 0 : index
      %16 = vector.load %arg5[%c0_13, %c0_14] : memref<8x256xbf16, #tpu.memory_space<vmem>>, vector<8x256xbf16>
      tpu.vector_store %arg5[%c0_13, %c0_14], %15 {strides = array<i32>} : memref<8x256xbf16, #tpu.memory_space<vmem>>, vector<8x256xbf16>,
    } else {
    }
    return
  }
  func.func @transform_0(%arg0: i32, %arg1: i32) -> (i32, i32) {
    %c0_i32 = arith.constant 0 : i32
    %c0_i32_0 = arith.constant 0 : i32
    %c0_i32_1 = arith.constant 0 : i32
    return %c0_i32, %c0_i32_0 : i32, i32
  }
  func.func @transform_1(%arg0: i32, %arg1: i32) -> (i32, i32) {
    %c0_i32 = arith.constant 0 : i32
    return %arg1, %arg0 : i32, i32
  }
  func.func @transform_2(%arg0: i32, %arg1: i32) -> (i32, i32) {
    %c0_i32 = arith.constant 0 : i32
    %c0_i32_0 = arith.constant 0 : i32
    %c0_i32_1 = arith.constant 0 : i32
    return %c0_i32, %c0_i32_0 : i32, i32
  }
  func.func @transform_3(%arg0: i32, %arg1: i32) -> (i32, i32) {
    %c0_i32 = arith.constant 0 : i32
    %c0_i32_0 = arith.constant 0 : i32
    return %c0_i32, %arg0 : i32, i32
  }
}

</mosaic_0001>

<bundles_post_ra>
// kernel: tpu_custom_call.1
= control target key start
LH: loop header
LB: loop body
LE: loop exit
PB: predicated region body
PF: predicated region fallthrough
CT: control target
= control target key end

     0   :  { %8 = vsyncpa [#allocation4], 0  ;;  %s776_s0 = inlined_call_operand.vmem [shape: bf16[8,40], index: 0, kind: input, shape index: {}]   ;;  %s777_s1 = inlined_call_operand.hbm [shape: bf16[40,512], index: 1, kind: input, shape index: {}]   ;;  %s778_s2 = inlined_call_operand.vmem [shape: f32[8,1], index: 2, kind: input, shape index: {}]   ;;  %s779_s3 = inlined_call_operand.hbm [shape: bf16[8,512], index: 3, kind: output, shape index: {}]  }
   0x1   :  { %10 = vsyncpa [#allocation4 + $0x1], 0 }
   0x2   :  { %11 = vsyncpa [#allocation5], 0 }
   0x3   :  { %13 = vsyncpa [#allocation5 + $0x1], 0  ;;  %s649_s12 = smov 0   ;;  %s651_s13 = smov 0  }
   0x4   :  { %s653_s14 = smov 0   ;;  %s655_s15 = smov 0  }
   0x5   :  { %s657_s16 = smov 0   ;;  %s659_s17 = smov 0  }
   0x6 LB: > { %s405_s18 = sadd.s32 4294967295, %s623_s17   ;;  %s406_s19 = sadd.s32 4294967294, %s623_s17   ;;  %s623_s17 = sphi %s659_s17, %s19_s17   ;;  %s619_s16 = sphi %s657_s16, %s788_s16   ;;  %s615_s15 = sphi %s655_s15, %s787_s15   ;;  %s611_s14 = sphi %s653_s14, %s786_s14   ;;  %s607_s13 = sphi %s651_s13, %s785_s13   ;;  %s603_s12 = sphi %s649_s12, %s784_s12  }
   0x7   : > { %s31_s20 = sadd.s32 1, %s619_s16  ;;  %s61_s21 = sadd.s32 1, %s611_s14 }
   0x8   : > { %p33_p0 = scmp.ge.s32.totalorder %s31_s20, 2  ;;  %p68_p1 = scmp.ne.s32.totalorder %s611_s14, %s607_s13 }
   0x9   : > { %p69_p2 = scmp.eq.s32.totalorder %s623_s17, 0  ;;  %p74_p3 = scmp.ne.s32.totalorder %s607_s13, %s603_s12 }
   0xa   : > { %s790_s20 = smov (%p33_p0, %s31_s20), 0  ;;  %p75_p5 = scmp.eq.s32.totalorder %s405_s18, 0 }
   0xb   : > { %p690_p4 = por %p69_p2, %p68_p1  ;;  %s57_s23 = ssub.s32 %s619_s16, %s790_s20 }
   0xc   : > { %p119_p6 = scmp.eq.s32.totalorder %s405_s18, 1  ;;  %p59_p7 = scmp.eq.s32.totalorder %s57_s23, 0 }
   0xd   : > { %p696_p8 = por %p75_p5, %p74_p3  ;;  %p125_p10 = scmp.eq.s32.totalorder %s406_s19, 1 }
   0xe   : > { %p700_p9 = por %p119_p6, %p68_p1  ;;  %p408_p12 = scmp.ge.s32.totalorder %s623_s17, 2 }
   0xf   : > { %s705_s26 = scalar_select %p59_p7, %s611_s14, %s61_s21  }
  0x10   : > { %p707_p11 = por %p125_p10, %p74_p3  ;;  %p456_p13 = scmp.lt.s32.totalorder %s623_s17, 2 }
  0x11   : > { %s151_s28 = sand.u32 1, %s611_s14   ;;  %s436_s30 = sshll.u32 %s619_s16, 3 }
  0x12   : > { %s442_s29 = smul.u32 40, %s151_s28  ;;  %p449_p0 = pnand %p456_p13, %p690_p4 }
  0x13   : > { %s163_s6 = scalar_lea.hbm %s777_s1, %s436_s30  ;;  %s152_s10 = scalar_lea.sflag [#allocation4], %s151_s28 }
  0x14   : > { %s164_s7 = sshll.u32 %s163_s6, 4  ;;  %s155_s8 = scalar_lea.vmem [#allocation3], %s442_s29  ;;  %s165_s7 = int_to_ptr.hbm [resolvable:$true] %s164_s7 }
  0x15   : > { %s166_s9 = sshll.u32 %s155_s8, 4  ;;  %s625_s11 = smov 256   ;;  %s167_s9 = int_to_ptr.vmem [resolvable:$true] %s166_s9 }
  0x16   : > { %s626_s18 = smov 128   ;;  %s627_s19 = smov 8  }
  0x17   : > { %451 = dma.hbm_to_vmem [thread:$0]  (!%p449_p0), %s165_s7, 640, %s167_s9, %s152_s10, %s625_s11, %s626_s18, %s627_s19  }
  0x18   : > { %p411_p1 = scmp.ge.s32.totalorder %s623_s17, 1  ;;  %p174_p2 = scmp.lt.s32.totalorder %s623_s17, 3 }
  0x1a   : > { %p175_p3 = pnand %p411_p1, %p174_p2 }
  0x1b   : > { %s723_s21 = sand.u32 (!%p175_p3), 1, %s607_s13  }
  0x1c   : > { %178 = sbr.rel (%p175_p3) target bundleno = 187 (0xbb), region = 32  ;;  %s181_s23 = scalar_lea.sflag (!%p175_p3), [#allocation4], %s723_s21 }
  0x1d   : > { %s443_s22 = smul.u32 (!%p175_p3), 40, %s723_s21 }
  0x1f   : > { %s184_s29 = scalar_lea.vmem (!%p175_p3), [#allocation3], %s443_s22 }
  0x21   : > { %594 = dma.done.wait (%p696_p8), %s181_s23, 640  }
  0x22   : > { %596 = vsyncadd (%p696_p8), %s181_s23, 4294966656  ;;  %v628_v0 = vmov 0   ;;  %v231_v1 = vld [vmem:[%s184_s29 + $0x20] sm:$0xff]  ;;  %vm261_vm0 = vcmask 1043456   ;;  %v423_v4 = vld [vmem:[%s184_s29 + $0x10] sm:$0xf] }
  0x23   : > { %510 = vset.pattern.permute.xlu0 %v628_v0  ;;  %v245_v2 = vunpack.c.l.b16 %v231_v1  ;;  %v246_v3 = vunpack.c.h.b16 %v231_v1  ;;  %v440_v5 = vld [vmem:[%s184_s29 + $0x14] sm:$0xf0]  ;;  %v439_v8 = vld [vmem:[%s184_s29 + $0x14] sm:$0xf]  ;;  %v425_v9 = vld [vmem:[%s184_s29 + $0x18] sm:$0xf0] }
  0x24   : > { %v216_v10 = vld [vmem:[%s778_s2] sm:$0xff]  ;;  %v424_v13 = vor.u32 %v440_v5, %v423_v4  ;;  %v428_v14 = vor.u32 %v439_v8, %v425_v9  ;;  %v438_v16 = vld [vmem:[%s184_s29 + $0x4] sm:$0xf0]  ;;  %v417_v18 = vld [vmem:[%s184_s29 + $0x8] sm:$0xf0]  ;;  %vm257_vm1 = vcmask 326656  }
  0x25   : > { %v251_v6 = vpack.c.b16 %v245_v2, %v245_v2  ;;  %v252_v7 = vpack.c.b16 %v246_v3, %v246_v3  ;;  %219 = vperm.xlu0 %510, %v216_v10   ;;  %v415_v15 = vld [vmem:[%s184_s29] sm:$0xf]  ;;  %v437_v17 = vld [vmem:[%s184_s29 + $0x4] sm:$0xf]  ;;  %s412_s5 = sshll.u32 %s723_s21, 3  ;;  %s441_s6 = sshll.u32 %s615_s15, 3 }
  0x26   : > { %v416_v19 = vor.u32 %v438_v16, %v415_v15  ;;  %v420_v20 = vor.u32 %v437_v17, %v417_v18  ;;  %v224_v21 = vld [vmem:[%s776_s0] sm:$0xf]  ;;  %s319_s9 = scalar_lea.hbm %s779_s3, %s441_s6  ;;  %s207_s10 = scalar_lea.vmem [#allocation6], %s412_s5 }
  0x27   : > { %v263_v11 = vsel %vm261_vm0, %v251_v6, 0  ;;  %v266_v12 = vsel %vm261_vm0, %v252_v7, 0  ;;  %s321_s11 = sshll.u32 %s207_s10, 4  ;;  %s323_s18 = sshll.u32 %s319_s9, 4  ;;  %s322_s11 = int_to_ptr.vmem [resolvable:$true] %s321_s11  ;;  %s324_s18 = int_to_ptr.hbm [resolvable:$true] %s323_s18 }
  0x28   : > { %273 = vmatpush.bf16.msra.mxu0 %v263_v11  ;;  %286 = vmatpush.bf16.msra.mxu1 %v266_v12  ;;  %s308_s15 = scalar_lea.sflag [#allocation5], %s723_s21  ;;  %s555_s19 = sshra.s32 %s324_s18, 4  ;;  %s556_s19 = int_to_ptr.hbm [resolvable:$true] %s555_s19 }
  0x29   : > { %s557_s22 = scalar_lea.hbm %s556_s19, 8  ;;  %s561_s28 = scalar_lea.hbm %s779_s3, 16 }
  0x2a   : > { %p558_p4 = scmp.ne.s32.totalorder %s556_s19, %s557_s22  ;;  %p562_p7 = scmp.lt.s32.totalorder %s556_s19, %s779_s3 }
  0x2b   : > { %p563_p8 = scmp.lt.s32.totalorder %s561_s28, %s557_s22 }
  0x2c   : > { %274 = vmatpush.bf16.msra.mxu0 %v424_v13  ;;  %287 = vmatpush.bf16.msra.mxu1 %v428_v14  ;;  %p559_p5 = pnand %p558_p4, %p700_p9 }
  0x2d   : > { %p564_p10 = por %p563_p8, %p562_p7 }
  0x2e   : > { %p560_p6 = pneg %p559_p5 }
  0x30   : > { %275 = vmatpush.bf16.msra.mxu0 %v416_v19  ;;  %288 = vmatpush.bf16.msra.mxu1 %v420_v20  ;;  %p565_p13 = pnand %p564_p10, %p560_p6 }
  0x33   : > { %429 = vmatmul.msk.bf16.vlgmr.msra.gmra.mxu0 %vm257_vm1, %v224_v21  ;;  %430 = vmatmul.msk.bf16.vlgmr.msra.gmra.mxu1 %vm257_vm1, %v224_v21 }
  0x97   : > { %v220_v22 = vpop.permute.xlu0 %219 }
  0xb0   : > { %v277_v23 = vpop.f32.mrf.mxu0  ;;  %v290_v24 = vpop.f32.mrf.mxu1 }
  0xb1   : > { %v294_v25 = vadd.f32 %v277_v23, %v220_v22  ;;  %v295_v26 = vadd.f32 %v290_v24, %v220_v22 }
  0xb3   : > { %v303_v27 = vmax.f32 %v294_v25, 0.0  ;;  %v304_v28 = vmax.f32 %v295_v26, 0.0 }
  0xb5   : > { %v305_v29 = vpack.c.bf16 %v304_v28, %v303_v27 }
  0xb7   : > { %306 = vst [vmem:[%s207_s10] sm:$0xff] %v305_v29 }
  0xb8   : > { %v279_v30 = vpop.f32.mrf.mxu0  ;;  %v292_v31 = vpop.f32.mrf.mxu1 }
  0xb9   : > { %568 = shalt.err (!%p565_p13)
}
  0xba   : > { %446 = dma.vmem_to_hbm [thread:$0]  (%p700_p9), %s322_s11, 128, %s324_s18, %s308_s15  }
  0xbb PF: > { %s335_s21 = sand.u32 1, %s603_s12   ;;  %p453_p0 = pnand %p408_p12, %p707_p11 }
  0xbc   : > { %s336_s4 = scalar_lea.sflag [#allocation5], %s335_s21 }
  0xbd   : > { %p454_p1 = pneg %p453_p0 }
  0xbf   : > { %598 = dma.done.wait (%p454_p1), %s336_s4, 128  }
  0xc0   : > { %600 = vsyncadd (%p454_p1), %s336_s4, 4294967168  ;;  %s19_s17 = sadd.s32 1, %s623_s17   ;;  %s784_s12 = smov %s607_s13 }
  0xc1   : > { %p16_p2 = scmp.ge.s32.totalorder %s19_s17, 4   ;;  %s785_s13 = smov %s611_s14 }
  0xc2   : > { %s786_s14 = smov %s705_s26  ;;  %s787_s15 = smov %s619_s16 }
  0xc3   : > { %s788_s16 = smov %s790_s20  ;;  %18 = sbr.rel (!%p16_p2) target bundleno = 6 (0x6), region = 85 }
  0xc8   :  { %342 = vsyncpa [#allocation4], 1 }
  0xc9   :  { %344 = vsyncpa [#allocation4 + $0x1], 1 }
  0xca   :  { %345 = vsyncpa [#allocation5], 1 }
  0xcb   :  { %347 = vsyncpa [#allocation5 + $0x1], 1 }

</bundles_post_ra>
